<compile_context>
chip_gen: v7x
topology: tpu7x:2x2x1
jax: 0.10.0
libtpu: 0.0.40
codegen_flags: <defaults>
</compile_context>

<pallas_src>
import functools

import jax
import jax.numpy as jnp
from jax.experimental import pallas as pl
from jax.experimental.pallas import tpu as pltpu


# ----------------------------------------------------------------------------
# Fused kernel: chain Tree-LSTM recurrence (A and B stacked) + SRFF head
# ----------------------------------------------------------------------------
def fused_tree_lstm_sr_kernel(x_ref, wx_ref, uh_ref, b_ref,
                              w_ma_ref, bh_ref, wp_ref, bp_ref,
                              target_ref, scores_ref,
                              hc_out_ref, loss_ref, rank_ref,
                              xw_scr):
    # x_ref    : (T*Bp, D)  bf16   leaf embeddings, time-major, A|B|pad batch
    # wx_ref   : (D, 4H)    bf16
    # uh_ref   : (H, 4H)    bf16
    # b_ref    : (1, 4H)    f32
    # w_ma_ref : (2H, H)    f32    stacked [Wm; Wa]
    # bh_ref   : (1, H)     f32
    # wp_ref   : (H, C)     f32
    # bp_ref   : (1, C)     f32
    # target_ref: (B, C)    f32    sparse target distribution
    # scores_ref: (1, C)    f32    score values 1..C
    # hc_out_ref: (Bp, 2H)  f32    [h | c] slab
    # xw_scr   : (T*Bp, 4H) f32    hoisted input projections (bias folded in)
    TB = x_ref.shape[0]
    Bp = hc_out_ref.shape[0]
    H = uh_ref.shape[0]
    T = TB // Bp
    B = target_ref.shape[0]

    # ---- Hoisted input projection: one MXU matmul for every timestep. ----
    xw_scr[...] = (jnp.dot(x_ref[...], wx_ref[...],
                           preferred_element_type=jnp.float32)
                   + b_ref[...])

    uh = uh_ref[...]                                   # resident across steps

    # Hoisted per-lane gate constants (built once; JAX doesn't CSE broadcasts).
    # Lanes [0,3H): i/f/o gates -> sigmoid.  Lanes [3H,4H): u gate -> tanh.
    lane = jax.lax.broadcasted_iota(jnp.int32, (Bp, 4 * H), 1)
    is_u = lane >= 3 * H
    gscale = jnp.where(is_u, 2.0, 1.0).astype(jnp.float32)   # 1 or 2
    gshift = jnp.where(is_u, 1.0, 0.0).astype(jnp.float32)   # 0 or 1

    def activate(gates):
        # Single EUP pass over the whole (Bp, 4H) tile:
        #   sigmoid lanes:  sigmoid(g) * 1 - 0
        #   tanh lanes:     sigmoid(2g) * 2 - 1  == tanh(g)
        return jax.nn.sigmoid(gates * gscale) * gscale - gshift

    # ---- Peeled t = 0 (h = c = 0): no h @ Uh, no f * c term. ----
    act0 = activate(xw_scr[0:Bp, :])
    i0 = act0[:, 0 * H:1 * H]
    o0 = act0[:, 2 * H:3 * H]
    u0 = act0[:, 3 * H:4 * H]
    c0 = i0 * u0
    h0 = o0 * jnp.tanh(c0)

    # ---- Remaining T-1 steps: only the unavoidable h @ Uh on the serial path.
    def step(t, carry):
        h, c = carry
        row = pl.multiple_of(t * Bp, Bp)
        gates = (xw_scr[pl.ds(row, Bp), :]
                 + jnp.dot(h.astype(jnp.bfloat16), uh,
                           preferred_element_type=jnp.float32))
        act = activate(gates)
        i = act[:, 0 * H:1 * H]
        f = act[:, 1 * H:2 * H]
        o = act[:, 2 * H:3 * H]
        u = act[:, 3 * H:4 * H]
        c_new = i * u + f * c
        h_new = o * jnp.tanh(c_new)
        return (h_new, c_new)

    h, c = jax.lax.fori_loop(1, T, step, (h0, c0), unroll=True)

    # Emit roots as one [h | c] slab.
    hc_out_ref[...] = jnp.concatenate([h, c], axis=1)

    # ---- Fused SRFF head (epilogue; roots never leave VMEM). ----
    hA = h[0:B, :]
    hB = h[B:2 * B, :]
    mult = hA * hB
    adiff = jnp.abs(hA - hB)
    feat = jnp.concatenate([mult, adiff], axis=1)            # (B, 2H)

    hid = jax.nn.sigmoid(
        jnp.dot(feat, w_ma_ref[...], preferred_element_type=jnp.float32)
        + bh_ref[...])

    logits = (jnp.dot(hid, wp_ref[...], preferred_element_type=jnp.float32)
              + bp_ref[...])

    m = jnp.max(logits, axis=-1, keepdims=True)
    e = jnp.exp(logits - m)
    denom = jnp.sum(e, axis=-1, keepdims=True)
    p = e / denom
    logp = (logits - m) - jnp.log(denom)

    t_ = target_ref[...]
    # KL(target || p) with 0 * log 0 := 0, averaged over the batch.
    safe_t = jnp.where(t_ > 0, t_, 1.0)
    kl = jnp.where(t_ > 0, t_ * (jnp.log(safe_t) - logp), 0.0)
    loss_ref[...] = jnp.sum(kl, keepdims=True) / jnp.float32(B)

    # rank = expected score: lane reduction on the VPU (no 1-lane MXU dot).
    rank_ref[...] = jnp.sum(p * scores_ref[...], axis=-1, keepdims=True)


# ----------------------------------------------------------------------------
# Glue (plain JAX): target distribution + parameter init + full forward
# ----------------------------------------------------------------------------
def score_to_dist(scores_true, num_classes, lo=1):
    """Tai et al. sparse target distribution over integer score bins."""
    s = jnp.asarray(scores_true, jnp.float32)
    fl = jnp.floor(s)
    idx = jnp.arange(lo, lo + num_classes, dtype=jnp.float32)
    lower = (idx[None, :] == fl[:, None]).astype(jnp.float32) * (fl + 1.0 - s)[:, None]
    upper = (idx[None, :] == (fl + 1.0)[:, None]).astype(jnp.float32) * (s - fl)[:, None]
    return lower + upper


def init_params(key, input_dim, hidden_dim, num_scores):
    ks = jax.random.split(key, 7)
    scale = 0.1
    return dict(
        wx=scale * jax.random.normal(ks[0], (input_dim, 4 * hidden_dim), jnp.float32),
        uh=scale * jax.random.normal(ks[1], (hidden_dim, 4 * hidden_dim), jnp.float32),
        b=jnp.zeros((1, 4 * hidden_dim), jnp.float32),
        wm=scale * jax.random.normal(ks[2], (hidden_dim, hidden_dim), jnp.float32),
        wa=scale * jax.random.normal(ks[3], (hidden_dim, hidden_dim), jnp.float32),
        bh=jnp.zeros((1, hidden_dim), jnp.float32),
        wp=scale * jax.random.normal(ks[4], (hidden_dim, num_scores), jnp.float32),
        bp=jnp.zeros((1, num_scores), jnp.float32),
    )


@functools.partial(jax.jit, static_argnames=("num_scores",))
def tree_lstm_sr_forward(params, xA, xB, scores_true, num_scores=5):
    """Mirrors treeLSTM_SR.forward: returns
       (loss, rank, root_hidden_A, root_hidden_B, root_cell_A, root_cell_B)."""
    T, B, D = xA.shape
    H = params["uh"].shape[0]
    Bp = ((2 * B + 7) // 8) * 8                      # merged A|B batch, padded to 8 sublanes

    x = jnp.concatenate([xA, xB], axis=1)            # (T, 2B, D): rows [0,B)=A, [B,2B)=B
    x = jnp.pad(x, ((0, 0), (0, Bp - 2 * B), (0, 0)))
    x = x.reshape(T * Bp, D).astype(jnp.bfloat16)    # flat for one hoisted matmul

    wx = params["wx"].astype(jnp.bfloat16)
    uh = params["uh"].astype(jnp.bfloat16)
    w_ma = jnp.concatenate([params["wm"], params["wa"]], axis=0)   # (2H, H)

    target = score_to_dist(scores_true, num_scores)
    scores_row = jnp.arange(1, 1 + num_scores, dtype=jnp.float32).reshape(1, num_scores)

    hc, loss, rank = pl.pallas_call(
        fused_tree_lstm_sr_kernel,
        out_shape=(jax.ShapeDtypeStruct((Bp, 2 * H), jnp.float32),
                   jax.ShapeDtypeStruct((1, 1), jnp.float32),
                   jax.ShapeDtypeStruct((B, 1), jnp.float32)),
        scratch_shapes=[pltpu.VMEM((T * Bp, 4 * H), jnp.float32)],
    )(x, wx, uh, params["b"], w_ma, params["bh"], params["wp"], params["bp"],
      target, scores_row)

    h_all = hc[:, :H]
    c_all = hc[:, H:]
    hA, hB = h_all[:B], h_all[B:2 * B]
    cA, cB = c_all[:B], c_all[B:2 * B]
    return loss[0, 0], rank[:, 0], hA, hB, cA, cB


# ----------------------------------------------------------------------------
# Pure-JAX reference (f32) for correctness checking
# ----------------------------------------------------------------------------
def reference_forward(params, xA, xB, scores_true, num_scores=5):
    T, B, D = xA.shape
    H = params["uh"].shape[0]

    def chain(x):
        def step(carry, x_t):
            h, c = carry
            gates = x_t @ params["wx"] + h @ params["uh"] + params["b"]
            i = jax.nn.sigmoid(gates[:, 0 * H:1 * H])
            f = jax.nn.sigmoid(gates[:, 1 * H:2 * H])
            o = jax.nn.sigmoid(gates[:, 2 * H:3 * H])
            u = jnp.tanh(gates[:, 3 * H:4 * H])
            c_new = i * u + f * c
            h_new = o * jnp.tanh(c_new)
            return (h_new, c_new), None
        init = (jnp.zeros((B, H), jnp.float32), jnp.zeros((B, H), jnp.float32))
        (h, c), _ = jax.lax.scan(step, init, x)
        return h, c

    hA, cA = chain(xA)
    hB, cB = chain(xB)
    mult = hA * hB
    adiff = jnp.abs(hA - hB)
    hid = jax.nn.sigmoid(mult @ params["wm"] + adiff @ params["wa"] + params["bh"])
    logits = hid @ params["wp"] + params["bp"]
    logp = jax.nn.log_softmax(logits, axis=-1)
    p = jnp.exp(logp)
    t = score_to_dist(scores_true, num_scores)
    safe_t = jnp.where(t > 0, t, 1.0)
    kl = jnp.where(t > 0, t * (jnp.log(safe_t) - logp), 0.0)
    loss = jnp.sum(kl) / B
    rank = p @ jnp.arange(1, 1 + num_scores, dtype=jnp.float32)
    return loss, rank, hA, hB, cA, cB


if __name__ == "__main__":
    # Small shapes consistent with the module: batch of tree pairs, chain trees
    # of T leaf embeddings, input_dim = hidden_dim = 32, 5 score classes.
    B, T, D, H, C = 2, 8, 32, 32, 5

    key = jax.random.PRNGKey(0)
    k_par, k_a, k_b = jax.random.split(key, 3)

    params = init_params(k_par, D, H, C)
    xA = jax.random.normal(k_a, (T, B, D), jnp.float32)   # layout: (T, B, D)
    xB = jax.random.normal(k_b, (T, B, D), jnp.float32)
    scores_true = jnp.array([3.4, 4.0], jnp.float32)

    out = tree_lstm_sr_forward(params, xA, xB, scores_true, num_scores=C)
    out = jax.block_until_ready(out)
    loss, rank, hA, hB, cA, cB = out

    assert loss.shape == ()
    assert rank.shape == (B,)
    assert hA.shape == (B, H) and cB.shape == (B, H)
    assert bool(jnp.isfinite(loss)) and bool(jnp.all(jnp.isfinite(rank)))

    # Check against the pure-JAX f32 reference (bf16 MXU path -> loose tol).
    ref = reference_forward(params, xA, xB, scores_true, num_scores=C)
    names = ("loss", "rank", "hA", "hB", "cA", "cB")
    for name, got, want in zip(names, out, ref):
        ok = bool(jnp.allclose(got, want, rtol=5e-2, atol=5e-2))
        assert ok, f"mismatch in {name}"

    print("KERNEL_OK")
</pallas_src>

<mosaic_0001>
module attributes {stable_mosaic.version = 11 : i64} {
  func.func @fused_tree_lstm_sr_kernel(%arg0: memref<64x32xbf16, #tpu.memory_space<vmem>>, %arg1: memref<32x128xbf16, #tpu.memory_space<vmem>>, %arg2: memref<32x128xbf16, #tpu.memory_space<vmem>>, %arg3: memref<1x128xf32, #tpu.memory_space<vmem>>, %arg4: memref<64x32xf32, #tpu.memory_space<vmem>>, %arg5: memref<1x32xf32, #tpu.memory_space<vmem>>, %arg6: memref<32x5xf32, #tpu.memory_space<vmem>>, %arg7: memref<1x5xf32, #tpu.memory_space<vmem>>, %arg8: memref<2x5xf32, #tpu.memory_space<vmem>>, %arg9: memref<1x5xf32, #tpu.memory_space<vmem>>, %arg10: memref<8x64xf32, #tpu.memory_space<vmem>>, %arg11: memref<1x1xf32, #tpu.memory_space<vmem>>, %arg12: memref<2x1xf32, #tpu.memory_space<vmem>>, %arg13: memref<64x128xf32, #tpu.memory_space<vmem>>) attributes {dimension_semantics = [], scalar_prefetch = 0 : i64, scratch_operands = 1 : i64, tpu.core_type = #tpu.core_type<tc>} {
    %c0 = arith.constant 0 : index
    %c0_0 = arith.constant 0 : index
    %0 = vector.load %arg0[%c0, %c0_0] : memref<64x32xbf16, #tpu.memory_space<vmem>>, vector<64x32xbf16>
    %c0_1 = arith.constant 0 : index
    %c0_2 = arith.constant 0 : index
    %1 = vector.load %arg1[%c0_1, %c0_2] : memref<32x128xbf16, #tpu.memory_space<vmem>>, vector<32x128xbf16>
    %cst = arith.constant dense<0.000000e+00> : vector<64x128xf32>
    %2 = tpu.matmul %0, %1, %cst {dimension_numbers = #tpu.dot_dimension_numbers<[1], [0], [0], [1], [0, 0, 1, 1], [], []>} : vector<64x32xbf16>, vector<32x128xbf16>, vector<64x128xf32> -> vector<64x128xf32>
    %c0_3 = arith.constant 0 : index
    %c0_4 = arith.constant 0 : index
    %3 = vector.load %arg3[%c0_3, %c0_4] : memref<1x128xf32, #tpu.memory_space<vmem>>, vector<1x128xf32>
    %4 = vector.broadcast %3 : vector<1x128xf32> to vector<64x128xf32>
    %5 = arith.addf %2, %4 : vector<64x128xf32>
    %c0_5 = arith.constant 0 : index
    %c0_6 = arith.constant 0 : index
    %6 = vector.load %arg13[%c0_5, %c0_6] : memref<64x128xf32, #tpu.memory_space<vmem>>, vector<64x128xf32>
    tpu.vector_store %arg13[%c0_5, %c0_6], %5 {strides = array<i32>} : memref<64x128xf32, #tpu.memory_space<vmem>>, vector<64x128xf32>,
    %c0_7 = arith.constant 0 : index
    %c0_8 = arith.constant 0 : index
    %7 = vector.load %arg2[%c0_7, %c0_8] : memref<32x128xbf16, #tpu.memory_space<vmem>>, vector<32x128xbf16>
    %8 = tpu.iota {dimensions = array<i32: 1>} : vector<8x128xi32>
    %c96_i32 = arith.constant 96 : i32
    %9 = vector.broadcast %c96_i32 : i32 to vector<8x128xi32>
    %10 = arith.cmpi sge, %8, %9 : vector<8x128xi32>
    %cst_9 = arith.constant 2.000000e+00 : f32
    %cst_10 = arith.constant 1.000000e+00 : f32
    %11 = vector.broadcast %cst_9 : f32 to vector<8x128xf32>
    %12 = vector.broadcast %cst_10 : f32 to vector<8x128xf32>
    %13 = arith.select %10, %11, %12 : vector<8x128xi1>, vector<8x128xf32>
    %cst_11 = arith.constant 1.000000e+00 : f32
    %cst_12 = arith.constant 0.000000e+00 : f32
    %14 = vector.broadcast %cst_11 : f32 to vector<8x128xf32>
    %15 = vector.broadcast %cst_12 : f32 to vector<8x128xf32>
    %16 = arith.select %10, %14, %15 : vector<8x128xi1>, vector<8x128xf32>
    %c0_13 = arith.constant 0 : index
    %c0_14 = arith.constant 0 : index
    %17 = vector.load %arg13[%c0_13, %c0_14] : memref<64x128xf32, #tpu.memory_space<vmem>>, vector<8x128xf32>
    %18 = arith.mulf %17, %13 : vector<8x128xf32>
    %19 = arith.negf %18 : vector<8x128xf32>
    %20 = math.exp %19 : vector<8x128xf32>
    %cst_15 = arith.constant 1.000000e+00 : f32
    %21 = vector.broadcast %cst_15 : f32 to vector<8x128xf32>
    %22 = arith.addf %21, %20 : vector<8x128xf32>
    %23 = arith.divf %21, %22 : vector<8x128xf32>
    %24 = arith.mulf %23, %13 : vector<8x128xf32>
    %25 = arith.subf %24, %16 : vector<8x128xf32>
    %26 = vector.extract_strided_slice %25 {offsets = [0, 0], sizes = [8, 32], strides = [1, 1]} : vector<8x128xf32> to vector<8x32xf32>
    %27 = vector.extract_strided_slice %25 {offsets = [0, 64], sizes = [8, 32], strides = [1, 1]} : vector<8x128xf32> to vector<8x32xf32>
    %28 = vector.extract_strided_slice %25 {offsets = [0, 96], sizes = [8, 32], strides = [1, 1]} : vector<8x128xf32> to vector<8x32xf32>
    %29 = arith.mulf %26, %28 : vector<8x32xf32>
    %30 = math.tanh %29 : vector<8x32xf32>
    %31 = arith.mulf %27, %30 : vector<8x32xf32>
    %c1_i32 = arith.constant 1 : i32
    %c8_i32 = arith.constant 8 : i32
    %32 = arith.muli %c1_i32, %c8_i32 : i32
    %33 = tpu.assume_multiple %32, 8 : i32
    %34 = arith.index_cast %33 : i32 to index
    %c0_16 = arith.constant 0 : index
    %35 = vector.load %arg13[%34, %c0_16] : memref<64x128xf32, #tpu.memory_space<vmem>>, vector<8x128xf32>
    %36 = arith.truncf %31 : vector<8x32xf32> to vector<8x32xbf16>
    %cst_17 = arith.constant dense<0.000000e+00> : vector<8x128xf32>
    %37 = tpu.matmul %36, %7, %cst_17 {dimension_numbers = #tpu.dot_dimension_numbers<[1], [0], [0], [1], [0, 0, 1, 1], [], []>} : vector<8x32xbf16>, vector<32x128xbf16>, vector<8x128xf32> -> vector<8x128xf32>
    %38 = arith.addf %35, %37 : vector<8x128xf32>
    %39 = arith.mulf %38, %13 : vector<8x128xf32>
    %40 = arith.negf %39 : vector<8x128xf32>
    %41 = math.exp %40 : vector<8x128xf32>
    %cst_18 = arith.constant 1.000000e+00 : f32
    %42 = vector.broadcast %cst_18 : f32 to vector<8x128xf32>
    %43 = arith.addf %42, %41 : vector<8x128xf32>
    %44 = arith.divf %42, %43 : vector<8x128xf32>
    %45 = arith.mulf %44, %13 : vector<8x128xf32>
    %46 = arith.subf %45, %16 : vector<8x128xf32>
    %47 = vector.extract_strided_slice %46 {offsets = [0, 0], sizes = [8, 32], strides = [1, 1]} : vector<8x128xf32> to vector<8x32xf32>
    %48 = vector.extract_strided_slice %46 {offsets = [0, 32], sizes = [8, 32], strides = [1, 1]} : vector<8x128xf32> to vector<8x32xf32>
    %49 = vector.extract_strided_slice %46 {offsets = [0, 64], sizes = [8, 32], strides = [1, 1]} : vector<8x128xf32> to vector<8x32xf32>
    %50 = vector.extract_strided_slice %46 {offsets = [0, 96], sizes = [8, 32], strides = [1, 1]} : vector<8x128xf32> to vector<8x32xf32>
    %51 = arith.mulf %47, %50 : vector<8x32xf32>
    %52 = arith.mulf %48, %29 : vector<8x32xf32>
    %53 = arith.addf %51, %52 : vector<8x32xf32>
    %54 = math.tanh %53 : vector<8x32xf32>
    %55 = arith.mulf %49, %54 : vector<8x32xf32>
    %c2_i32 = arith.constant 2 : i32
    %c8_i32_19 = arith.constant 8 : i32
    %56 = arith.muli %c2_i32, %c8_i32_19 : i32
    %57 = tpu.assume_multiple %56, 8 : i32
    %58 = arith.index_cast %57 : i32 to index
    %c0_20 = arith.constant 0 : index
    %59 = vector.load %arg13[%58, %c0_20] : memref<64x128xf32, #tpu.memory_space<vmem>>, vector<8x128xf32>
    %60 = arith.truncf %55 : vector<8x32xf32> to vector<8x32xbf16>
    %cst_21 = arith.constant dense<0.000000e+00> : vector<8x128xf32>
    %61 = tpu.matmul %60, %7, %cst_21 {dimension_numbers = #tpu.dot_dimension_numbers<[1], [0], [0], [1], [0, 0, 1, 1], [], []>} : vector<8x32xbf16>, vector<32x128xbf16>, vector<8x128xf32> -> vector<8x128xf32>
    %62 = arith.addf %59, %61 : vector<8x128xf32>
    %63 = arith.mulf %62, %13 : vector<8x128xf32>
    %64 = arith.negf %63 : vector<8x128xf32>
    %65 = math.exp %64 : vector<8x128xf32>
    %cst_22 = arith.constant 1.000000e+00 : f32
    %66 = vector.broadcast %cst_22 : f32 to vector<8x128xf32>
    %67 = arith.addf %66, %65 : vector<8x128xf32>
    %68 = arith.divf %66, %67 : vector<8x128xf32>
    %69 = arith.mulf %68, %13 : vector<8x128xf32>
    %70 = arith.subf %69, %16 : vector<8x128xf32>
    %71 = vector.extract_strided_slice %70 {offsets = [0, 0], sizes = [8, 32], strides = [1, 1]} : vector<8x128xf32> to vector<8x32xf32>
    %72 = vector.extract_strided_slice %70 {offsets = [0, 32], sizes = [8, 32], strides = [1, 1]} : vector<8x128xf32> to vector<8x32xf32>
    %73 = vector.extract_strided_slice %70 {offsets = [0, 64], sizes = [8, 32], strides = [1, 1]} : vector<8x128xf32> to vector<8x32xf32>
    %74 = vector.extract_strided_slice %70 {offsets = [0, 96], sizes = [8, 32], strides = [1, 1]} : vector<8x128xf32> to vector<8x32xf32>
    %75 = arith.mulf %71, %74 : vector<8x32xf32>
    %76 = arith.mulf %72, %53 : vector<8x32xf32>
    %77 = arith.addf %75, %76 : vector<8x32xf32>
    %78 = math.tanh %77 : vector<8x32xf32>
    %79 = arith.mulf %73, %78 : vector<8x32xf32>
    %c3_i32 = arith.constant 3 : i32
    %c8_i32_23 = arith.constant 8 : i32
    %80 = arith.muli %c3_i32, %c8_i32_23 : i32
    %81 = tpu.assume_multiple %80, 8 : i32
    %82 = arith.index_cast %81 : i32 to index
    %c0_24 = arith.constant 0 : index
    %83 = vector.load %arg13[%82, %c0_24] : memref<64x128xf32, #tpu.memory_space<vmem>>, vector<8x128xf32>
    %84 = arith.truncf %79 : vector<8x32xf32> to vector<8x32xbf16>
    %cst_25 = arith.constant dense<0.000000e+00> : vector<8x128xf32>
    %85 = tpu.matmul %84, %7, %cst_25 {dimension_numbers = #tpu.dot_dimension_numbers<[1], [0], [0], [1], [0, 0, 1, 1], [], []>} : vector<8x32xbf16>, vector<32x128xbf16>, vector<8x128xf32> -> vector<8x128xf32>
    %86 = arith.addf %83, %85 : vector<8x128xf32>
    %87 = arith.mulf %86, %13 : vector<8x128xf32>
    %88 = arith.negf %87 : vector<8x128xf32>
    %89 = math.exp %88 : vector<8x128xf32>
    %cst_26 = arith.constant 1.000000e+00 : f32
    %90 = vector.broadcast %cst_26 : f32 to vector<8x128xf32>
    %91 = arith.addf %90, %89 : vector<8x128xf32>
    %92 = arith.divf %90, %91 : vector<8x128xf32>
    %93 = arith.mulf %92, %13 : vector<8x128xf32>
    %94 = arith.subf %93, %16 : vector<8x128xf32>
    %95 = vector.extract_strided_slice %94 {offsets = [0, 0], sizes = [8, 32], strides = [1, 1]} : vector<8x128xf32> to vector<8x32xf32>
    %96 = vector.extract_strided_slice %94 {offsets = [0, 32], sizes = [8, 32], strides = [1, 1]} : vector<8x128xf32> to vector<8x32xf32>
    %97 = vector.extract_strided_slice %94 {offsets = [0, 64], sizes = [8, 32], strides = [1, 1]} : vector<8x128xf32> to vector<8x32xf32>
    %98 = vector.extract_strided_slice %94 {offsets = [0, 96], sizes = [8, 32], strides = [1, 1]} : vector<8x128xf32> to vector<8x32xf32>
    %99 = arith.mulf %95, %98 : vector<8x32xf32>
    %100 = arith.mulf %96, %77 : vector<8x32xf32>
    %101 = arith.addf %99, %100 : vector<8x32xf32>
    %102 = math.tanh %101 : vector<8x32xf32>
    %103 = arith.mulf %97, %102 : vector<8x32xf32>
    %c4_i32 = arith.constant 4 : i32
    %c8_i32_27 = arith.constant 8 : i32
    %104 = arith.muli %c4_i32, %c8_i32_27 : i32
    %105 = tpu.assume_multiple %104, 8 : i32
    %106 = arith.index_cast %105 : i32 to index
    %c0_28 = arith.constant 0 : index
    %107 = vector.load %arg13[%106, %c0_28] : memref<64x128xf32, #tpu.memory_space<vmem>>, vector<8x128xf32>
    %108 = arith.truncf %103 : vector<8x32xf32> to vector<8x32xbf16>
    %cst_29 = arith.constant dense<0.000000e+00> : vector<8x128xf32>
    %109 = tpu.matmul %108, %7, %cst_29 {dimension_numbers = #tpu.dot_dimension_numbers<[1], [0], [0], [1], [0, 0, 1, 1], [], []>} : vector<8x32xbf16>, vector<32x128xbf16>, vector<8x128xf32> -> vector<8x128xf32>
    %110 = arith.addf %107, %109 : vector<8x128xf32>
    %111 = arith.mulf %110, %13 : vector<8x128xf32>
    %112 = arith.negf %111 : vector<8x128xf32>
    %113 = math.exp %112 : vector<8x128xf32>
    %cst_30 = arith.constant 1.000000e+00 : f32
    %114 = vector.broadcast %cst_30 : f32 to vector<8x128xf32>
    %115 = arith.addf %114, %113 : vector<8x128xf32>
    %116 = arith.divf %114, %115 : vector<8x128xf32>
    %117 = arith.mulf %116, %13 : vector<8x128xf32>
    %118 = arith.subf %117, %16 : vector<8x128xf32>
    %119 = vector.extract_strided_slice %118 {offsets = [0, 0], sizes = [8, 32], strides = [1, 1]} : vector<8x128xf32> to vector<8x32xf32>
    %120 = vector.extract_strided_slice %118 {offsets = [0, 32], sizes = [8, 32], strides = [1, 1]} : vector<8x128xf32> to vector<8x32xf32>
    %121 = vector.extract_strided_slice %118 {offsets = [0, 64], sizes = [8, 32], strides = [1, 1]} : vector<8x128xf32> to vector<8x32xf32>
    %122 = vector.extract_strided_slice %118 {offsets = [0, 96], sizes = [8, 32], strides = [1, 1]} : vector<8x128xf32> to vector<8x32xf32>
    %123 = arith.mulf %119, %122 : vector<8x32xf32>
    %124 = arith.mulf %120, %101 : vector<8x32xf32>
    %125 = arith.addf %123, %124 : vector<8x32xf32>
    %126 = math.tanh %125 : vector<8x32xf32>
    %127 = arith.mulf %121, %126 : vector<8x32xf32>
    %c5_i32 = arith.constant 5 : i32
    %c8_i32_31 = arith.constant 8 : i32
    %128 = arith.muli %c5_i32, %c8_i32_31 : i32
    %129 = tpu.assume_multiple %128, 8 : i32
    %130 = arith.index_cast %129 : i32 to index
    %c0_32 = arith.constant 0 : index
    %131 = vector.load %arg13[%130, %c0_32] : memref<64x128xf32, #tpu.memory_space<vmem>>, vector<8x128xf32>
    %132 = arith.truncf %127 : vector<8x32xf32> to vector<8x32xbf16>
    %cst_33 = arith.constant dense<0.000000e+00> : vector<8x128xf32>
    %133 = tpu.matmul %132, %7, %cst_33 {dimension_numbers = #tpu.dot_dimension_numbers<[1], [0], [0], [1], [0, 0, 1, 1], [], []>} : vector<8x32xbf16>, vector<32x128xbf16>, vector<8x128xf32> -> vector<8x128xf32>
    %134 = arith.addf %131, %133 : vector<8x128xf32>
    %135 = arith.mulf %134, %13 : vector<8x128xf32>
    %136 = arith.negf %135 : vector<8x128xf32>
    %137 = math.exp %136 : vector<8x128xf32>
    %cst_34 = arith.constant 1.000000e+00 : f32
    %138 = vector.broadcast %cst_34 : f32 to vector<8x128xf32>
    %139 = arith.addf %138, %137 : vector<8x128xf32>
    %140 = arith.divf %138, %139 : vector<8x128xf32>
    %141 = arith.mulf %140, %13 : vector<8x128xf32>
    %142 = arith.subf %141, %16 : vector<8x128xf32>
    %143 = vector.extract_strided_slice %142 {offsets = [0, 0], sizes = [8, 32], strides = [1, 1]} : vector<8x128xf32> to vector<8x32xf32>
    %144 = vector.extract_strided_slice %142 {offsets = [0, 32], sizes = [8, 32], strides = [1, 1]} : vector<8x128xf32> to vector<8x32xf32>
    %145 = vector.extract_strided_slice %142 {offsets = [0, 64], sizes = [8, 32], strides = [1, 1]} : vector<8x128xf32> to vector<8x32xf32>
    %146 = vector.extract_strided_slice %142 {offsets = [0, 96], sizes = [8, 32], strides = [1, 1]} : vector<8x128xf32> to vector<8x32xf32>
    %147 = arith.mulf %143, %146 : vector<8x32xf32>
    %148 = arith.mulf %144, %125 : vector<8x32xf32>
    %149 = arith.addf %147, %148 : vector<8x32xf32>
    %150 = math.tanh %149 : vector<8x32xf32>
    %151 = arith.mulf %145, %150 : vector<8x32xf32>
    %c6_i32 = arith.constant 6 : i32
    %c8_i32_35 = arith.constant 8 : i32
    %152 = arith.muli %c6_i32, %c8_i32_35 : i32
    %153 = tpu.assume_multiple %152, 8 : i32
    %154 = arith.index_cast %153 : i32 to index
    %c0_36 = arith.constant 0 : index
    %155 = vector.load %arg13[%154, %c0_36] : memref<64x128xf32, #tpu.memory_space<vmem>>, vector<8x128xf32>
    %156 = arith.truncf %151 : vector<8x32xf32> to vector<8x32xbf16>
    %cst_37 = arith.constant dense<0.000000e+00> : vector<8x128xf32>
    %157 = tpu.matmul %156, %7, %cst_37 {dimension_numbers = #tpu.dot_dimension_numbers<[1], [0], [0], [1], [0, 0, 1, 1], [], []>} : vector<8x32xbf16>, vector<32x128xbf16>, vector<8x128xf32> -> vector<8x128xf32>
    %158 = arith.addf %155, %157 : vector<8x128xf32>
    %159 = arith.mulf %158, %13 : vector<8x128xf32>
    %160 = arith.negf %159 : vector<8x128xf32>
    %161 = math.exp %160 : vector<8x128xf32>
    %cst_38 = arith.constant 1.000000e+00 : f32
    %162 = vector.broadcast %cst_38 : f32 to vector<8x128xf32>
    %163 = arith.addf %162, %161 : vector<8x128xf32>
    %164 = arith.divf %162, %163 : vector<8x128xf32>
    %165 = arith.mulf %164, %13 : vector<8x128xf32>
    %166 = arith.subf %165, %16 : vector<8x128xf32>
    %167 = vector.extract_strided_slice %166 {offsets = [0, 0], sizes = [8, 32], strides = [1, 1]} : vector<8x128xf32> to vector<8x32xf32>
    %168 = vector.extract_strided_slice %166 {offsets = [0, 32], sizes = [8, 32], strides = [1, 1]} : vector<8x128xf32> to vector<8x32xf32>
    %169 = vector.extract_strided_slice %166 {offsets = [0, 64], sizes = [8, 32], strides = [1, 1]} : vector<8x128xf32> to vector<8x32xf32>
    %170 = vector.extract_strided_slice %166 {offsets = [0, 96], sizes = [8, 32], strides = [1, 1]} : vector<8x128xf32> to vector<8x32xf32>
    %171 = arith.mulf %167, %170 : vector<8x32xf32>
    %172 = arith.mulf %168, %149 : vector<8x32xf32>
    %173 = arith.addf %171, %172 : vector<8x32xf32>
    %174 = math.tanh %173 : vector<8x32xf32>
    %175 = arith.mulf %169, %174 : vector<8x32xf32>
    %c7_i32 = arith.constant 7 : i32
    %c8_i32_39 = arith.constant 8 : i32
    %176 = arith.muli %c7_i32, %c8_i32_39 : i32
    %177 = tpu.assume_multiple %176, 8 : i32
    %178 = arith.index_cast %177 : i32 to index
    %c0_40 = arith.constant 0 : index
    %179 = vector.load %arg13[%178, %c0_40] : memref<64x128xf32, #tpu.memory_space<vmem>>, vector<8x128xf32>
    %180 = arith.truncf %175 : vector<8x32xf32> to vector<8x32xbf16>
    %cst_41 = arith.constant dense<0.000000e+00> : vector<8x128xf32>
    %181 = tpu.matmul %180, %7, %cst_41 {dimension_numbers = #tpu.dot_dimension_numbers<[1], [0], [0], [1], [0, 0, 1, 1], [], []>} : vector<8x32xbf16>, vector<32x128xbf16>, vector<8x128xf32> -> vector<8x128xf32>
    %182 = arith.addf %179, %181 : vector<8x128xf32>
    %183 = arith.mulf %182, %13 : vector<8x128xf32>
    %184 = arith.negf %183 : vector<8x128xf32>
    %185 = math.exp %184 : vector<8x128xf32>
    %cst_42 = arith.constant 1.000000e+00 : f32
    %186 = vector.broadcast %cst_42 : f32 to vector<8x128xf32>
    %187 = arith.addf %186, %185 : vector<8x128xf32>
    %188 = arith.divf %186, %187 : vector<8x128xf32>
    %189 = arith.mulf %188, %13 : vector<8x128xf32>
    %190 = arith.subf %189, %16 : vector<8x128xf32>
    %191 = vector.extract_strided_slice %190 {offsets = [0, 0], sizes = [8, 32], strides = [1, 1]} : vector<8x128xf32> to vector<8x32xf32>
    %192 = vector.extract_strided_slice %190 {offsets = [0, 32], sizes = [8, 32], strides = [1, 1]} : vector<8x128xf32> to vector<8x32xf32>
    %193 = vector.extract_strided_slice %190 {offsets = [0, 64], sizes = [8, 32], strides = [1, 1]} : vector<8x128xf32> to vector<8x32xf32>
    %194 = vector.extract_strided_slice %190 {offsets = [0, 96], sizes = [8, 32], strides = [1, 1]} : vector<8x128xf32> to vector<8x32xf32>
    %195 = arith.mulf %191, %194 : vector<8x32xf32>
    %196 = arith.mulf %192, %173 : vector<8x32xf32>
    %197 = arith.addf %195, %196 : vector<8x32xf32>
    %198 = math.tanh %197 : vector<8x32xf32>
    %199 = arith.mulf %193, %198 : vector<8x32xf32>
    %c7_i32_43 = arith.constant 7 : i32
    %200 = tpu.concatenate %199, %197 in 1 : vector<8x32xf32>, vector<8x32xf32> -> vector<8x64xf32>
    %c0_44 = arith.constant 0 : index
    %c0_45 = arith.constant 0 : index
    %201 = vector.load %arg10[%c0_44, %c0_45] : memref<8x64xf32, #tpu.memory_space<vmem>>, vector<8x64xf32>
    tpu.vector_store %arg10[%c0_44, %c0_45], %200 {strides = array<i32>} : memref<8x64xf32, #tpu.memory_space<vmem>>, vector<8x64xf32>,
    %202 = vector.extract_strided_slice %199 {offsets = [0, 0], sizes = [2, 32], strides = [1, 1]} : vector<8x32xf32> to vector<2x32xf32>
    %203 = vector.extract_strided_slice %199 {offsets = [2, 0], sizes = [2, 32], strides = [1, 1]} : vector<8x32xf32> to vector<2x32xf32>
    %204 = arith.mulf %202, %203 : vector<2x32xf32>
    %205 = arith.subf %202, %203 : vector<2x32xf32>
    %206 = math.absf %205 : vector<2x32xf32>
    %207 = tpu.concatenate %204, %206 in 1 : vector<2x32xf32>, vector<2x32xf32> -> vector<2x64xf32>
    %c0_46 = arith.constant 0 : index
    %c0_47 = arith.constant 0 : index
    %208 = vector.load %arg4[%c0_46, %c0_47] : memref<64x32xf32, #tpu.memory_space<vmem>>, vector<64x32xf32>
    %cst_48 = arith.constant dense<0.000000e+00> : vector<2x32xf32>
    %209 = tpu.matmul %207, %208, %cst_48 {dimension_numbers = #tpu.dot_dimension_numbers<[1], [0], [0], [1], [0, 0, 1, 1], [], []>} : vector<2x64xf32>, vector<64x32xf32>, vector<2x32xf32> -> vector<2x32xf32>
    %c0_49 = arith.constant 0 : index
    %c0_50 = arith.constant 0 : index
    %210 = vector.load %arg5[%c0_49, %c0_50] : memref<1x32xf32, #tpu.memory_space<vmem>>, vector<1x32xf32>
    %211 = vector.broadcast %210 : vector<1x32xf32> to vector<2x32xf32>
    %212 = arith.addf %209, %211 : vector<2x32xf32>
    %213 = arith.negf %212 : vector<2x32xf32>
    %214 = math.exp %213 : vector<2x32xf32>
    %cst_51 = arith.constant 1.000000e+00 : f32
    %215 = vector.broadcast %cst_51 : f32 to vector<2x32xf32>
    %216 = arith.addf %215, %214 : vector<2x32xf32>
    %217 = arith.divf %215, %216 : vector<2x32xf32>
    %c0_52 = arith.constant 0 : index
    %c0_53 = arith.constant 0 : index
    %218 = vector.load %arg6[%c0_52, %c0_53] : memref<32x5xf32, #tpu.memory_space<vmem>>, vector<32x5xf32>
    %cst_54 = arith.constant dense<0.000000e+00> : vector<2x5xf32>
    %219 = tpu.matmul %217, %218, %cst_54 {dimension_numbers = #tpu.dot_dimension_numbers<[1], [0], [0], [1], [0, 0, 1, 1], [], []>} : vector<2x32xf32>, vector<32x5xf32>, vector<2x5xf32> -> vector<2x5xf32>
    %c0_55 = arith.constant 0 : index
    %c0_56 = arith.constant 0 : index
    %220 = vector.load %arg7[%c0_55, %c0_56] : memref<1x5xf32, #tpu.memory_space<vmem>>, vector<1x5xf32>
    %221 = vector.broadcast %220 : vector<1x5xf32> to vector<2x5xf32>
    %222 = arith.addf %219, %221 : vector<2x5xf32>
    %cst_57 = arith.constant dense<0xFF800000> : vector<2xf32>
    %223 = vector.multi_reduction <maximumf>, %222, %cst_57 [1] : vector<2x5xf32> to vector<2xf32>
    %224 = vector.shape_cast %223 : vector<2xf32> to vector<2x1xf32>
    %225 = vector.broadcast %224 : vector<2x1xf32> to vector<2x5xf32>
    %226 = arith.subf %222, %225 : vector<2x5xf32>
    %227 = math.exp %226 : vector<2x5xf32>
    %cst_58 = arith.constant dense<0.000000e+00> : vector<2xf32>
    %228 = vector.multi_reduction <add>, %227, %cst_58 [1] : vector<2x5xf32> to vector<2xf32>
    %229 = vector.shape_cast %228 : vector<2xf32> to vector<2x1xf32>
    %230 = vector.broadcast %229 : vector<2x1xf32> to vector<2x5xf32>
    %231 = arith.divf %227, %230 : vector<2x5xf32>
    %232 = vector.broadcast %224 : vector<2x1xf32> to vector<2x5xf32>
    %233 = arith.subf %222, %232 : vector<2x5xf32>
    %234 = math.log %229 : vector<2x1xf32>
    %235 = vector.broadcast %234 : vector<2x1xf32> to vector<2x5xf32>
    %236 = arith.subf %233, %235 : vector<2x5xf32>
    %c0_59 = arith.constant 0 : index
    %c0_60 = arith.constant 0 : index
    %237 = vector.load %arg8[%c0_59, %c0_60] : memref<2x5xf32, #tpu.memory_space<vmem>>, vector<2x5xf32>
    %cst_61 = arith.constant 0.000000e+00 : f32
    %238 = vector.broadcast %cst_61 : f32 to vector<2x5xf32>
    %239 = arith.cmpf ogt, %237, %238 : vector<2x5xf32>
    %cst_62 = arith.constant 1.000000e+00 : f32
    %240 = vector.broadcast %cst_62 : f32 to vector<2x5xf32>
    %241 = arith.select %239, %237, %240 : vector<2x5xi1>, vector<2x5xf32>
    %cst_63 = arith.constant 0.000000e+00 : f32
    %242 = vector.broadcast %cst_63 : f32 to vector<2x5xf32>
    %243 = arith.cmpf ogt, %237, %242 : vector<2x5xf32>
    %244 = math.log %241 : vector<2x5xf32>
    %245 = arith.subf %244, %236 : vector<2x5xf32>
    %246 = arith.mulf %237, %245 : vector<2x5xf32>
    %cst_64 = arith.constant 0.000000e+00 : f32
    %247 = vector.broadcast %cst_64 : f32 to vector<2x5xf32>
    %248 = arith.select %243, %246, %247 : vector<2x5xi1>, vector<2x5xf32>
    %249 = vector.shape_cast %248 : vector<2x5xf32> to vector<1x2x5xf32>
    %cst_65 = arith.constant dense<0.000000e+00> : vector<1xf32>
    %250 = vector.multi_reduction <add>, %249, %cst_65 [1, 2] : vector<1x2x5xf32> to vector<1xf32>
    %251 = vector.shape_cast %250 : vector<1xf32> to vector<1x1x1xf32>
    %252 = vector.extract %251[0, 0, 0] : f32 from vector<1x1x1xf32>
    %253 = vector.broadcast %252 : f32 to vector<1x1xf32>
    %cst_66 = arith.constant 2.000000e+00 : f32
    %254 = vector.broadcast %cst_66 : f32 to vector<1x1xf32>
    %255 = arith.divf %253, %254 : vector<1x1xf32>
    %c0_67 = arith.constant 0 : index
    %c0_68 = arith.constant 0 : index
    %256 = vector.load %arg11[%c0_67, %c0_68] : memref<1x1xf32, #tpu.memory_space<vmem>>, vector<1x1xf32>
    tpu.vector_store %arg11[%c0_67, %c0_68], %255 {strides = array<i32>} : memref<1x1xf32, #tpu.memory_space<vmem>>, vector<1x1xf32>,
    %c0_69 = arith.constant 0 : index
    %c0_70 = arith.constant 0 : index
    %257 = vector.load %arg9[%c0_69, %c0_70] : memref<1x5xf32, #tpu.memory_space<vmem>>, vector<1x5xf32>
    %258 = vector.broadcast %257 : vector<1x5xf32> to vector<2x5xf32>
    %259 = arith.mulf %231, %258 : vector<2x5xf32>
    %cst_71 = arith.constant dense<0.000000e+00> : vector<2xf32>
    %260 = vector.multi_reduction <add>, %259, %cst_71 [1] : vector<2x5xf32> to vector<2xf32>
    %261 = vector.shape_cast %260 : vector<2xf32> to vector<2x1xf32>
    %c0_72 = arith.constant 0 : index
    %c0_73 = arith.constant 0 : index
    %262 = vector.load %arg12[%c0_72, %c0_73] : memref<2x1xf32, #tpu.memory_space<vmem>>, vector<2x1xf32>
    tpu.vector_store %arg12[%c0_72, %c0_73], %261 {strides = array<i32>} : memref<2x1xf32, #tpu.memory_space<vmem>>, vector<2x1xf32>,
    return
  }
}

</mosaic_0001>

<bundles_post_ra>
// kernel: tree_lstm_sr_forward.1
= control target key start
LH: loop header
LB: loop body
LE: loop exit
PB: predicated region body
PF: predicated region fallthrough
CT: control target
= control target key end

     0   :  { %vm91_vm0 = vcmask 261120   ;;  %s1693_s0 = inlined_call_operand.vmem [shape: bf16[64,32], index: 0, kind: input, shape index: {}]   ;;  %s1694_s1 = inlined_call_operand.vmem [shape: bf16[32,128], index: 1, kind: input, shape index: {}]   ;;  %s1695_s2 = inlined_call_operand.vmem [shape: bf16[32,128], index: 2, kind: input, shape index: {}]   ;;  %s1696_s3 = inlined_call_operand.vmem [shape: f32[1,128], index: 3, kind: input, shape index: {}]   ;;  %s1697_s4 = inlined_call_operand.vmem [shape: f32[64,32], index: 4, kind: input, shape index: {}]   ;;  %s1698_s5 = inlined_call_operand.vmem [shape: f32[1,32], index: 5, kind: input, shape index: {}]   ;;  %s1699_s6 = inlined_call_operand.vmem [shape: f32[32,5], index: 6, kind: input, shape index: {}]   ;;  %s1700_s7 = inlined_call_operand.vmem [shape: f32[1,5], index: 7, kind: input, shape index: {}]   ;;  %s1701_s8 = inlined_call_operand.vmem [shape: f32[2,5], index: 8, kind: input, shape index: {}]   ;;  %s1702_s9 = inlined_call_operand.vmem [shape: f32[1,5], index: 9, kind: input, shape index: {}]   ;;  %s1703_s10 = inlined_call_operand.vmem [shape: f32[8,64], index: 10, kind: output, shape index: {0}]   ;;  %s1704_s11 = inlined_call_operand.hbm [shape: f32[1,1], index: 11, kind: output, shape index: {1}]   ;;  %s1705_s12 = inlined_call_operand.vmem [shape: f32[2,1], index: 12, kind: output, shape index: {2}]  }
   0x1   :  { %v1256_v0 = vld [vmem:[%s1694_s1] sm:$0xff]   ;;  %v1257_v1 = vld [vmem:[%s1694_s1 + $0x8] sm:$0xff]  }
   0x2   :  { %1130 = vmatprep.subr.bf16.mxu0 %v1256_v0  ;;  %v1258_v2 = vld [vmem:[%s1693_s0] sm:$0xff]   ;;  %v1259_v3 = vld [vmem:[%s1693_s0 + $0x8] sm:$0xff]  }
   0x3   :  { %1131 = vmatpush3.bf16.msra.mxu0 %v1256_v0  ;;  %1134 = vmatprep.mubr.msk.bf16.mxu0 %vm91_vm0, %v1258_v2 }
   0x4   :  { %1132 = vmatprep.subr.bf16.mxu0 %v1257_v1 }
   0x5   :  { %18 = vsyncpa [#allocation4], 0  ;;  %v1348_v4 = vmov 0.0   ;;  %v181_v5 = vlaneseq  ;;  %v1440_v7 = vld [vmem:[%s1696_s3] ss:$0 sm:$0xff]  ;;  %v1349_v10 = vmov 1.0  }
   0x6   :  { %1142 = vmatprep.subr.bf16.mxu1 %v1348_v4  ;;  %s1350_s3 = smov 32   ;;  %v1461_v25 = vld [vmem:[%s1695_s2] sm:$0xff]   ;;  %vm1351_vm2 = vmmov 0   ;;  %v1469_v26 = vld [vmem:[%s1695_s2 + $0x8] sm:$0xff]   ;;  %s1352_s16 = smov 64   ;;  %vm788_vm3 = vcmask 523264  }
   0x7   :  { %1133 = vmatpush3.bf16.msra.mxu0 %v1257_v1  ;;  %v182_v6 = vand.u32 127, %v181_v5  ;;  %1146 = vmatprep.mubr.msk.bf16.mxu1 %vm1351_vm2, %v1348_v4  ;;  %s1353_s2 = smov 96   ;;  %vm982_vm4 = vcmask 33792   ;;  %vm1031_vm6 = vcmask 1024   ;;  %vm1018_vm7 = vcmask 0  }
   0x8   :  { %1158 = vmatprep.subr.bf16.mxu0 %v1348_v4  ;;  %1143 = vmatpush3.bf16.msra.mxu1 %v1461_v25 }
   0x9   :  { %vm183_vm1 = vcmp.ge.s32.totalorder %v182_v6, 96  ;;  %1144 = vmatprep.subr.bf16.mxu1 %v1348_v4 }
   0xa   :  { %1135 = vmatmul.mubr.msk.bf16.vlgmr.msra.gmra.mrb[0].mxu0 %vm91_vm0, %v1259_v3  ;;  %v1445_v11 = vsel %vm183_vm1, 2.0, %v1349_v10  ;;  %v1453_v20 = vsel %vm183_vm1, 1.0, %v1348_v4 }
   0xb   :  { %1159 = vmatpush3.bf16.msra.mxu0 %v1461_v25 }
   0xc   :  { %1160 = vmatprep.subr.bf16.mxu0 %v1348_v4  ;;  %1145 = vmatpush3.bf16.msra.mxu1 %v1469_v26 }
   0xd   :  { %1150 = vmatprep.subr.bf16.mxu1 %v1348_v4 }
   0xf   :  { %1161 = vmatpush3.bf16.msra.mxu0 %v1469_v26 }
  0x10   :  { %1174 = vmatprep.subr.bf16.mxu0 %v1348_v4 }
  0xdd   :  { %v1442_v8 = vpop.f32.mrb[0].mxu0 }
  0xde   :  { %v138_v9 = vpop.f32.mrb[1].mxu0  ;;  %v147_v56 = vadd.f32 %v1442_v8, %v1440_v7 }
  0xdf   :  { %v139_v12 = vadd.f32 %v1440_v7, %v138_v9  ;;  %v1448_v13 = vpop.f32.mrb[2].mxu0 }
  0xe0   :  { %v141_v14 = vpop.f32.mrb[3].mxu0 }
  0xe1   :  { %v187_v15 = vmul.f32 %v1445_v11, %v139_v12  ;;  %v142_v32 = vadd.f32 %v1440_v7, %v141_v14 }
  0xe3   :  { %v1066_v16 = vmul.f32 -1.442695, %v187_v15  ;;  %v1262_v15 = vld [vmem:[%s1693_s0 + $0x10] sm:$0xff]  }
  0xe4   :  { %1138 = vmatprep.mubr.msk.bf16.mxu0 %vm91_vm0, %v1262_v15 }
  0xe5   :  { %1264 = vpow2.f32 %v1066_v16  ;;  %v1263_v16 = vld [vmem:[%s1693_s0 + $0x18] sm:$0xff]  }
  0xe6   :  { %1139 = vmatmul.mubr.msk.bf16.gmra.mrb[4].mxu0 %vm91_vm0, %v1263_v16 }
  0xe7   :  { %1162 = vmatprep.mubr.msk.bf16.mxu0 %vm1351_vm2, %v1348_v4 }
  0xef   :  { %v1265_v17 = vpop.eup %1264 }
  0xf0   :  { %v191_v18 = vadd.f32 1.0, %v1265_v17 }
  0xf2   :  { %1266 = vrcp.f32 %v191_v18 }
  0xfc   :  { %v1267_v19 = vpop.eup %1266 }
  0xfd   :  { %v194_v21 = vmul.f32 %v1267_v19, %v1445_v11 }
  0xff   :  { %v195_v22 = vsub.f32 %v194_v21, %v1453_v20 }
 0x101   :  { %197 = vrot.lane.b32.xlu0 %v195_v22, %s1350_s3 }
 0x173   :  { %v198_v23 = vpop.permute.xlu0 %197 }
 0x174   :  { %v200_v24 = vmul.f32 %v198_v23, %v195_v22 }
 0x176   :  { %1268 = vtanh.f32 %v200_v24 }
 0x180   :  { %v1269_v27 = vpop.eup %1268 }
 0x181   :  { %203 = vrot.lane.b32.xlu0 %v1269_v27, %s1352_s16 }
 0x1f3   :  { %v204_v28 = vpop.permute.xlu0 %203 }
 0x1f4   :  { %v206_v29 = vmul.f32 %v204_v28, %v195_v22  ;;  %v1524_v22 = vpop.f32.mrb[4].mxu0 }
 0x1f5   :  { %v154_v23 = vpop.f32.mrb[5].mxu0 }
 0x1f6   :  { %v209_v30 = vpack.c.bf16 %v206_v29, %v206_v29  ;;  %v150_v29 = vadd.f32 %v1448_v13, %v1440_v7 }
 0x1f8   :  { %211 = vrot.lane.b32.xlu1 %v209_v30, %s1352_s16 }
 0x1fc   :  { %284 = vrot.lane.b32.xlu1 %v200_v24, %s1350_s3  ;;  %v1526_v24 = vpop.f32.mrb[6].mxu0 }
 0x1fd   :  { %v1528_v27 = vpop.f32.mrb[7].mxu0 }
 0x1fe   :  { %v158_v16 = vadd.f32 %v1440_v7, %v1528_v27 }
 0x26a   :  { %v212_v31 = vpop.permute.xlu1 %211 }
 0x26b   :  { %1147 = vmatmul.mubr.msk.bf16.vlgmr.msra.gmra.mrb[0].mxu1 %vm91_vm0, %v212_v31 }
 0x26c   :  { %1151 = vmatpush3.bf16.msra.mxu1 %v1461_v25  ;;  %1154 = vmatprep.mubr.msk.bf16.mxu1 %vm1351_vm2, %v1348_v4 }
 0x26d   :  { %1152 = vmatprep.subr.bf16.mxu1 %v1348_v4 }
 0x26e   :  { %v285_v45 = vpop.permute.xlu1 %284 }
 0x270   :  { %1153 = vmatpush3.bf16.msra.mxu1 %v1469_v26 }
 0x271   :  { %1166 = vmatprep.subr.bf16.mxu1 %v1348_v4 }
 0x33e   :  { %v262_v33 = vpop.f32.mrb[0].mxu1 }
 0x33f   :  { %v268_v34 = vadd.f32 %v262_v33, %v142_v32  ;;  %v1148_v35 = vpop.f32.mrb[1].mxu1 }
 0x340   :  { %v265_v36 = vpop.f32.mrb[2].mxu1 }
 0x341   :  { %v269_v37 = vmul.f32 %v268_v34, %v1445_v11  ;;  %v1149_v38 = vpop.f32.mrb[3].mxu1 }
 0x343   :  { %v1070_v39 = vmul.f32 -1.442695, %v269_v37 }
 0x345   :  { %1270 = vpow2.f32 %v1070_v39 }
 0x34f   :  { %v1271_v40 = vpop.eup %1270 }
 0x350   :  { %v273_v41 = vadd.f32 1.0, %v1271_v40 }
 0x352   :  { %1272 = vrcp.f32 %v273_v41 }
 0x35c   :  { %v1273_v42 = vpop.eup %1272 }
 0x35d   :  { %v276_v43 = vmul.f32 %v1273_v42, %v1445_v11 }
 0x35f   :  { %v277_v44 = vsub.f32 %v276_v43, %v1453_v20 }
 0x361   :  { %279 = vrot.lane.b32.xlu0 %v277_v44, %s1350_s3  ;;  %v287_v46 = vmul.f32 %v285_v45, %v277_v44 }
 0x363   :  { %289 = vrot.lane.b32.xlu1 %v287_v46, %s1353_s2 }
 0x3d3   :  { %v280_v47 = vpop.permute.xlu0 %279 }
 0x3d4   :  { %v282_v48 = vmul.f32 %v280_v47, %v277_v44 }
 0x3d5   :  { %v290_v49 = vpop.permute.xlu1 %289 }
 0x3d6   :  { %v292_v50 = vadd.f32 %v290_v49, %v282_v48 }
 0x3d8   :  { %1274 = vtanh.f32 %v292_v50 }
 0x3e2   :  { %v1275_v51 = vpop.eup %1274 }
 0x3e3   :  { %295 = vrot.lane.b32.xlu0 %v1275_v51, %s1352_s16 }
 0x3e7   :  { %364 = vrot.lane.b32.xlu0 %v292_v50, %s1350_s3 }
 0x455   :  { %v296_v52 = vpop.permute.xlu0 %295 }
 0x456   :  { %v298_v53 = vmul.f32 %v296_v52, %v277_v44  ;;  %v155_v52 = vadd.f32 %v1440_v7, %v154_v23 }
 0x458   :  { %v301_v54 = vpack.c.bf16 %v298_v53, %v298_v53 }
 0x459   :  { %v365_v6 = vpop.permute.xlu0 %364 }
 0x45a   :  { %303 = vrot.lane.b32.xlu1 %v301_v54, %s1352_s16 }
 0x4cc   :  { %v304_v55 = vpop.permute.xlu1 %303 }
 0x4cd   :  { %1155 = vmatmul.mubr.msk.bf16.vlgmr.msra.gmra.mrb[4].mxu1 %vm91_vm0, %v304_v55 }
 0x4ce   :  { %1167 = vmatpush3.bf16.msra.mxu1 %v1461_v25  ;;  %1170 = vmatprep.mubr.msk.bf16.mxu1 %vm1351_vm2, %v1348_v4 }
 0x4cf   :  { %1168 = vmatprep.subr.bf16.mxu1 %v1348_v4 }
 0x4d2   :  { %1169 = vmatpush3.bf16.msra.mxu1 %v1469_v26 }
 0x4d3   :  { %1182 = vmatprep.subr.bf16.mxu1 %v1348_v4 }
 0x5a0   :  { %v342_v57 = vpop.f32.mrb[4].mxu1 }
 0x5a1   :  { %v348_v58 = vadd.f32 %v342_v57, %v147_v56  ;;  %v1156_v59 = vpop.f32.mrb[5].mxu1 }
 0x5a2   :  { %v345_v60 = vpop.f32.mrb[6].mxu1 }
 0x5a3   :  { %v349_v61 = vmul.f32 %v348_v58, %v1445_v11  ;;  %v1157_v62 = vpop.f32.mrb[7].mxu1 }
 0x5a5   :  { %v1072_v63 = vmul.f32 -1.442695, %v349_v61 }
 0x5a7   :  { %1276 = vpow2.f32 %v1072_v63 }
 0x5b1   :  { %v1277_v0 = vpop.eup %1276 }
 0x5b2   :  { %v353_v1 = vadd.f32 1.0, %v1277_v0 }
 0x5b4   :  { %1278 = vrcp.f32 %v353_v1 }
 0x5be   :  { %v1279_v2 = vpop.eup %1278 }
 0x5bf   :  { %v356_v3 = vmul.f32 %v1279_v2, %v1445_v11 }
 0x5c1   :  { %v357_v5 = vsub.f32 %v356_v3, %v1453_v20 }
 0x5c3   :  { %359 = vrot.lane.b32.xlu1 %v357_v5, %s1350_s3  ;;  %v367_v8 = vmul.f32 %v365_v6, %v357_v5 }
 0x5c5   :  { %369 = vrot.lane.b32.xlu0 %v367_v8, %s1353_s2 }
 0x635   :  { %v360_v9 = vpop.permute.xlu1 %359 }
 0x636   :  { %v362_v10 = vmul.f32 %v360_v9, %v357_v5 }
 0x637   :  { %v370_v12 = vpop.permute.xlu0 %369 }
 0x638   :  { %v372_v14 = vadd.f32 %v370_v12, %v362_v10 }
 0x63a   :  { %1280 = vtanh.f32 %v372_v14 }
 0x644   :  { %v1281_v17 = vpop.eup %1280 }
 0x645   :  { %375 = vrot.lane.b32.xlu1 %v1281_v17, %s1352_s16 }
 0x649   :  { %444 = vrot.lane.b32.xlu1 %v372_v14, %s1350_s3 }
 0x6b7   :  { %v376_v18 = vpop.permute.xlu1 %375 }
 0x6b8   :  { %v378_v19 = vmul.f32 %v376_v18, %v357_v5 }
 0x6ba   :  { %v381_v21 = vpack.c.bf16 %v378_v19, %v378_v19 }
 0x6bb   :  { %v445_v42 = vpop.permute.xlu1 %444 }
 0x6bc   :  { %383 = vrot.lane.b32.xlu0 %v381_v21, %s1352_s16 }
 0x72e   :  { %v384_v28 = vpop.permute.xlu0 %383 }
 0x72f   :  { %1163 = vmatmul.mubr.msk.bf16.vlgmr.msra.gmra.mrb[8].mxu0 %vm91_vm0, %v384_v28 }
 0x730   :  { %1175 = vmatpush3.bf16.msra.mxu0 %v1461_v25  ;;  %1178 = vmatprep.mubr.msk.bf16.mxu0 %vm1351_vm2, %v1348_v4 }
 0x731   :  { %1176 = vmatprep.subr.bf16.mxu0 %v1348_v4 }
 0x734   :  { %1177 = vmatpush3.bf16.msra.mxu0 %v1469_v26 }
 0x735   :  { %1190 = vmatprep.subr.bf16.mxu0 %v1348_v4 }
 0x802   :  { %v422_v30 = vpop.f32.mrb[8].mxu0 }
 0x803   :  { %v428_v31 = vadd.f32 %v422_v30, %v150_v29  ;;  %v1164_v32 = vpop.f32.mrb[9].mxu0 }
 0x804   :  { %v425_v33 = vpop.f32.mrb[10].mxu0 }
 0x805   :  { %v429_v34 = vmul.f32 %v428_v31, %v1445_v11  ;;  %v1165_v35 = vpop.f32.mrb[11].mxu0 }
 0x807   :  { %v1074_v36 = vmul.f32 -1.442695, %v429_v34 }
 0x809   :  { %1282 = vpow2.f32 %v1074_v36 }
 0x813   :  { %v1283_v37 = vpop.eup %1282 }
 0x814   :  { %v433_v38 = vadd.f32 1.0, %v1283_v37 }
 0x816   :  { %1284 = vrcp.f32 %v433_v38 }
 0x820   :  { %v1285_v39 = vpop.eup %1284 }
 0x821   :  { %v436_v40 = vmul.f32 %v1285_v39, %v1445_v11 }
 0x823   :  { %v437_v41 = vsub.f32 %v436_v40, %v1453_v20 }
 0x825   :  { %439 = vrot.lane.b32.xlu0 %v437_v41, %s1350_s3  ;;  %v447_v13 = vmul.f32 %v445_v42, %v437_v41 }
 0x827   :  { %449 = vrot.lane.b32.xlu1 %v447_v13, %s1353_s2  ;;  %v163_v13 = vadd.f32 %v1524_v22, %v1440_v7 }
 0x897   :  { %v440_v43 = vpop.permute.xlu0 %439 }
 0x898   :  { %v442_v44 = vmul.f32 %v440_v43, %v437_v41 }
 0x899   :  { %v450_v45 = vpop.permute.xlu1 %449 }
 0x89a   :  { %v452_v46 = vadd.f32 %v450_v45, %v442_v44 }
 0x89c   :  { %1286 = vtanh.f32 %v452_v46 }
 0x8a6   :  { %v1287_v47 = vpop.eup %1286 }
 0x8a7   :  { %455 = vrot.lane.b32.xlu0 %v1287_v47, %s1352_s16 }
 0x8ab   :  { %524 = vrot.lane.b32.xlu0 %v452_v46, %s1350_s3 }
 0x919   :  { %v456_v48 = vpop.permute.xlu0 %455 }
 0x91a   :  { %v458_v49 = vmul.f32 %v456_v48, %v437_v41 }
 0x91c   :  { %v461_v50 = vpack.c.bf16 %v458_v49, %v458_v49 }
 0x91d   :  { %v525_v1 = vpop.permute.xlu0 %524 }
 0x91e   :  { %463 = vrot.lane.b32.xlu1 %v461_v50, %s1352_s16 }
 0x990   :  { %v464_v51 = vpop.permute.xlu1 %463 }
 0x991   :  { %1171 = vmatmul.mubr.msk.bf16.vlgmr.msra.gmra.mrb[8].mxu1 %vm91_vm0, %v464_v51 }
 0x992   :  { %1183 = vmatpush3.bf16.msra.mxu1 %v1461_v25  ;;  %1186 = vmatprep.mubr.msk.bf16.mxu1 %vm1351_vm2, %v1348_v4 }
 0x993   :  { %1184 = vmatprep.subr.bf16.mxu1 %v1348_v4 }
 0x996   :  { %1185 = vmatpush3.bf16.msra.mxu1 %v1469_v26 }
 0xa64   :  { %v502_v53 = vpop.f32.mrb[8].mxu1 }
 0xa65   :  { %v508_v54 = vadd.f32 %v502_v53, %v155_v52  ;;  %v1172_v55 = vpop.f32.mrb[9].mxu1 }
 0xa66   :  { %v505_v56 = vpop.f32.mrb[10].mxu1 }
 0xa67   :  { %v509_v57 = vmul.f32 %v508_v54, %v1445_v11  ;;  %v1173_v58 = vpop.f32.mrb[11].mxu1 }
 0xa69   :  { %v1076_v59 = vmul.f32 -1.442695, %v509_v57 }
 0xa6b   :  { %1288 = vpow2.f32 %v1076_v59 }
 0xa75   :  { %v1289_v60 = vpop.eup %1288 }
 0xa76   :  { %v513_v61 = vadd.f32 1.0, %v1289_v60 }
 0xa78   :  { %1290 = vrcp.f32 %v513_v61 }
 0xa82   :  { %v1291_v62 = vpop.eup %1290 }
 0xa83   :  { %v516_v63 = vmul.f32 %v1291_v62, %v1445_v11 }
 0xa85   :  { %v517_v0 = vsub.f32 %v516_v63, %v1453_v20 }
 0xa87   :  { %519 = vrot.lane.b32.xlu1 %v517_v0, %s1350_s3  ;;  %v527_v2 = vmul.f32 %v525_v1, %v517_v0  ;;  %v166_v1 = vadd.f32 %v1526_v24, %v1440_v7 }
 0xa89   :  { %529 = vrot.lane.b32.xlu0 %v527_v2, %s1353_s2 }
 0xaf9   :  { %v520_v3 = vpop.permute.xlu1 %519 }
 0xafa   :  { %v522_v5 = vmul.f32 %v520_v3, %v517_v0 }
 0xafb   :  { %v530_v6 = vpop.permute.xlu0 %529 }
 0xafc   :  { %v532_v8 = vadd.f32 %v530_v6, %v522_v5 }
 0xafe   :  { %1292 = vtanh.f32 %v532_v8 }
 0xb08   :  { %v1293_v9 = vpop.eup %1292 }
 0xb09   :  { %535 = vrot.lane.b32.xlu1 %v1293_v9, %s1352_s16 }
 0xb0d   :  { %604 = vrot.lane.b32.xlu1 %v532_v8, %s1350_s3 }
 0xb7b   :  { %v536_v10 = vpop.permute.xlu1 %535 }
 0xb7c   :  { %v538_v12 = vmul.f32 %v536_v10, %v517_v0 }
 0xb7e   :  { %v541_v14 = vpack.c.bf16 %v538_v12, %v538_v12 }
 0xb7f   :  { %v605_v33 = vpop.permute.xlu1 %604 }
 0xb80   :  { %543 = vrot.lane.b32.xlu0 %v541_v14, %s1352_s16 }
 0xbf2   :  { %v544_v15 = vpop.permute.xlu0 %543 }
 0xbf3   :  { %1179 = vmatmul.mubr.msk.bf16.vlgmr.msra.gmra.mrb[12].mxu0 %vm91_vm0, %v544_v15 }
 0xbf4   :  { %1191 = vmatpush3.bf16.msra.mxu0 %v1461_v25  ;;  %1194 = vmatprep.mubr.msk.bf16.mxu0 %vm1351_vm2, %v1348_v4 }
 0xbf5   :  { %1192 = vmatprep.subr.bf16.mxu0 %v1348_v4 }
 0xbf8   :  { %1193 = vmatpush3.bf16.msra.mxu0 %v1469_v26 }
 0xcc6   :  { %v582_v17 = vpop.f32.mrb[12].mxu0 }
 0xcc7   :  { %v588_v18 = vadd.f32 %v582_v17, %v158_v16  ;;  %v1180_v19 = vpop.f32.mrb[13].mxu0 }
 0xcc8   :  { %v585_v21 = vpop.f32.mrb[14].mxu0 }
 0xcc9   :  { %v589_v23 = vmul.f32 %v588_v18, %v1445_v11  ;;  %v1181_v28 = vpop.f32.mrb[15].mxu0 }
 0xcca   :  { %v1354_v28 = vmov 0.0|0.0  }
 0xccb   :  { %v1078_v29 = vmul.f32 -1.442695, %v589_v23  ;;  %v804_v23 = vld [vmem:[%s1697_s4] sm:$0xff]  ;;  %1228 = vmatprep.subr.bf16.mxu1 %v1354_v28  ;;  %1240 = vmatprep.subr.bf16.mxu0 %v1354_v28 }
 0xccd   :  { %1294 = vpow2.f32 %v1078_v29 }
 0xcd7   :  { %v1295_v25 = vpop.eup %1294 }
 0xcd8   :  { %v593_v30 = vadd.f32 1.0, %v1295_v25  ;;  %v807_v25 = vld [vmem:[%s1697_s4 + $0x18] sm:$0xff] }
 0xcda   :  { %1296 = vrcp.f32 %v593_v30 }
 0xce4   :  { %v1297_v31 = vpop.eup %1296 }
 0xce5   :  { %v596_v32 = vmul.f32 %v1297_v31, %v1445_v11 }
 0xce7   :  { %v597_v26 = vsub.f32 %v596_v32, %v1453_v20  ;;  %v808_v32 = vld [vmem:[%s1697_s4 + $0x20] sm:$0xff] }
 0xce9   :  { %599 = vrot.lane.b32.xlu0 %v597_v26, %s1350_s3  ;;  %v607_v27 = vmul.f32 %v605_v33, %v597_v26 }
 0xceb   :  { %609 = vrot.lane.b32.xlu1 %v607_v27, %s1353_s2  ;;  %v810_v27 = vld [vmem:[%s1697_s4 + $0x30] sm:$0xff] }
 0xd5b   :  { %v600_v34 = vpop.permute.xlu0 %599 }
 0xd5c   :  { %v602_v35 = vmul.f32 %v600_v34, %v597_v26  ;;  %v811_v34 = vld [vmem:[%s1697_s4 + $0x38] sm:$0xff] }
 0xd5d   :  { %v610_v36 = vpop.permute.xlu1 %609 }
 0xd5e   :  { %v612_v37 = vadd.f32 %v610_v36, %v602_v35  ;;  %v1238_v35 = vpack.c.bf16 %v811_v34, %v810_v27 }
 0xd60   :  { %1298 = vtanh.f32 %v612_v37 }
 0xd6a   :  { %v1299_v38 = vpop.eup %1298 }
 0xd6b   :  { %615 = vrot.lane.b32.xlu0 %v1299_v38, %s1352_s16 }
 0xd6f   :  { %684 = vrot.lane.b32.xlu0 %v612_v37, %s1350_s3 }
 0xddd   :  { %v616_v39 = vpop.permute.xlu0 %615 }
 0xdde   :  { %v618_v40 = vmul.f32 %v616_v39, %v597_v26  ;;  %v809_v26 = vld [vmem:[%s1697_s4 + $0x28] sm:$0xff] }
 0xddf   :  { %v1235_v33 = vpack.c.bf16 %v809_v26, %v808_v32 }
 0xde0   :  { %v621_v41 = vpack.c.bf16 %v618_v40, %v618_v40 }
 0xde1   :  { %v685_v55 = vpop.permute.xlu0 %684 }
 0xde2   :  { %623 = vrot.lane.b32.xlu1 %v621_v41, %s1352_s16 }
 0xe54   :  { %v624_v42 = vpop.permute.xlu1 %623 }
 0xe55   :  { %1187 = vmatmul.mubr.msk.bf16.vlgmr.msra.gmra.mrb[12].mxu1 %vm91_vm0, %v624_v42 }
 0xe56   :  { %1214 = vmatprep.mubr.msk.f32.mxu1 %vm1351_vm2, %v1348_v4 }
 0xf28   :  { %v662_v43 = vpop.f32.mrb[12].mxu1 }
 0xf29   :  { %v668_v44 = vadd.f32 %v662_v43, %v163_v13  ;;  %v1188_v45 = vpop.f32.mrb[13].mxu1 }
 0xf2a   :  { %v665_v46 = vpop.f32.mrb[14].mxu1  ;;  %v899_v45 = vld [vmem:[%s1699_s6 + $0x8] sm:$0xff] }
 0xf2b   :  { %v669_v47 = vmul.f32 %v668_v44, %v1445_v11  ;;  %v1189_v48 = vpop.f32.mrb[15].mxu1  ;;  %v898_v44 = vld [vmem:[%s1699_s6] sm:$0xff]  ;;  %v900_v46 = vld [vmem:[%s1699_s6 + $0x10] sm:$0xff] }
 0xf2c   :  { %v901_v48 = vld [vmem:[%s1699_s6 + $0x18] sm:$0xff] }
 0xf2d   :  { %v1080_v49 = vmul.f32 -1.442695, %v669_v47  ;;  %v1241_v47 = vpack.c.bf16 %v899_v45, %v898_v44 }
 0xf2f   :  { %1300 = vpow2.f32 %v1080_v49  ;;  %v1244_v49 = vpack.c.bf16 %v901_v48, %v900_v46 }
 0xf39   :  { %v1301_v50 = vpop.eup %1300 }
 0xf3a   :  { %v673_v51 = vadd.f32 1.0, %v1301_v50  ;;  %v1083_v50 = vld [vmem:[%s1698_s5] ss:$0 sm:$0xff] }
 0xf3c   :  { %1302 = vrcp.f32 %v673_v51 }
 0xf46   :  { %v1303_v52 = vpop.eup %1302 }
 0xf47   :  { %v676_v53 = vmul.f32 %v1303_v52, %v1445_v11 }
 0xf49   :  { %v677_v54 = vsub.f32 %v676_v53, %v1453_v20 }
 0xf4b   :  { %679 = vrot.lane.b32.xlu1 %v677_v54, %s1350_s3  ;;  %v687_v22 = vmul.f32 %v685_v55, %v677_v54 }
 0xf4d   :  { %689 = vrot.lane.b32.xlu0 %v687_v22, %s1353_s2 }
 0xfbd   :  { %v680_v56 = vpop.permute.xlu1 %679 }
 0xfbe   :  { %v682_v57 = vmul.f32 %v680_v56, %v677_v54 }
 0xfbf   :  { %v690_v58 = vpop.permute.xlu0 %689 }
 0xfc0   :  { %v692_v59 = vadd.f32 %v690_v58, %v682_v57  ;;  %v1086_v57 = vld [vmem:[%s1700_s7] ss:$0 sm:$0xff] }
 0xfc2   :  { %1304 = vtanh.f32 %v692_v59 }
 0xfcc   :  { %v1305_v60 = vpop.eup %1304 }
 0xfcd   :  { %695 = vrot.lane.b32.xlu1 %v1305_v60, %s1352_s16 }
 0xfd1   :  { %764 = vrot.lane.b32.xlu1 %v692_v59, %s1350_s3 }
0x103f   :  { %v696_v61 = vpop.permute.xlu1 %695 }
0x1040   :  { %v698_v62 = vmul.f32 %v696_v61, %v677_v54 }
0x1042   :  { %v701_v63 = vpack.c.bf16 %v698_v62, %v698_v62 }
0x1043   :  { %v765_v17 = vpop.permute.xlu1 %764 }
0x1044   :  { %703 = vrot.lane.b32.xlu0 %v701_v63, %s1352_s16 }
0x10b6   :  { %v704_v0 = vpop.permute.xlu0 %703 }
0x10b7   :  { %1195 = vmatmul.mubr.msk.bf16.vlgmr.msra.gmra.mrb[16].mxu0 %vm91_vm0, %v704_v0 }
0x10b8   :  { %1225 = vmatprep.mubr.msk.f32.mxu0 %vm1351_vm2, %v1348_v4  ;;  %1242 = vmatpush3.bf16.msra.mxu0 %v1241_v47 }
0x10b9   :  { %1243 = vmatprep.subr.bf16.mxu0 %v1354_v28 }
0x10bc   :  { %1245 = vmatpush3.bf16.msra.mxu0 %v1244_v49 }
0x118a   :  { %v742_v2 = vpop.f32.mrb[16].mxu0 }
0x118b   :  { %v748_v3 = vadd.f32 %v742_v2, %v166_v1  ;;  %v1196_v5 = vpop.f32.mrb[17].mxu0 }
0x118c   :  { %v745_v6 = vpop.f32.mrb[18].mxu0 }
0x118d   :  { %v749_v8 = vmul.f32 %v748_v3, %v1445_v11  ;;  %v1197_v9 = vpop.f32.mrb[19].mxu0  ;;  %v997_v3 = vld [vmem:[%s1701_s8] sm:$0x3] }
0x118e   :  { %vm998_vm5 = vcmp.gt.f32.partialorder %v997_v3, 0.0 }
0x118f   :  { %v1082_v10 = vmul.f32 -1.442695, %v749_v8  ;;  %v999_v5 = vsel %vm998_vm5, %v997_v3, 1.0 }
0x1191   :  { %1306 = vpow2.f32 %v1082_v10  ;;  %v1088_v10 = vld [vmem:[%s1702_s9] ss:$0 sm:$0xff] }
0x119b   :  { %v1307_v12 = vpop.eup %1306 }
0x119c   :  { %v753_v14 = vadd.f32 1.0, %v1307_v12 }
0x119e   :  { %1308 = vrcp.f32 %v753_v14 }
0x11a8   :  { %v1309_v15 = vpop.eup %1308 }
0x11a9   :  { %v756_v16 = vmul.f32 %v1309_v15, %v1445_v11  ;;  %v805_v11 = vld [vmem:[%s1697_s4 + $0x8] sm:$0xff] }
0x11aa   :  { %v1229_v29 = vpack.c.bf16 %v805_v11, %v804_v23 }
0x11ab   :  { %v757_v4 = vsub.f32 %v756_v16, %v1453_v20  ;;  %v806_v20 = vld [vmem:[%s1697_s4 + $0x10] sm:$0xff] }
0x11ac   :  { %1230 = vmatpush3.bf16.msra.mxu1 %v1229_v29  ;;  %v1232_v30 = vpack.c.bf16 %v807_v25, %v806_v20 }
0x11ad   :  { %759 = vrot.lane.b32.xlu0 %v757_v4, %s1350_s3  ;;  %v767_v7 = vmul.f32 %v765_v17, %v757_v4  ;;  %1231 = vmatprep.subr.bf16.mxu1 %v1354_v28 }
0x11af   :  { %769 = vrot.lane.b32.xlu1 %v767_v7, %s1353_s2 }
0x11b0   :  { %1233 = vmatpush3.bf16.msra.mxu1 %v1232_v30 }
0x11b1   :  { %1234 = vmatprep.subr.bf16.mxu1 %v1354_v28 }
0x11b4   :  { %1236 = vmatpush3.bf16.msra.mxu1 %v1235_v33 }
0x11b5   :  { %1237 = vmatprep.subr.bf16.mxu1 %v1354_v28 }
0x11b8   :  { %1239 = vmatpush3.bf16.msra.mxu1 %v1238_v35 }
0x121f   :  { %v760_v24 = vpop.permute.xlu0 %759 }
0x1220   :  { %v762_v18 = vmul.f32 %v760_v24, %v757_v4 }
0x1221   :  { %v770_v19 = vpop.permute.xlu1 %769 }
0x1222   :  { %v1601_v21 = vadd.f32 %v770_v19, %v762_v18 }
0x1224   :  { %1310 = vtanh.f32 %v1601_v21 }
0x122e   :  { %v1311_v31 = vpop.eup %1310 }
0x122f   :  { %775 = vrot.lane.b32.xlu0 %v1311_v31, %s1352_s16 }
0x12a1   :  { %v776_v36 = vpop.permute.xlu0 %775 }
0x12a2   :  { %v1629_v37 = vmul.f32 %v776_v36, %v757_v4 }
0x12a4   :  { %v790_v38 = vrot.slane %v1629_v37, 2 }
0x12a6   :  { %v792_v39 = vmul.f32 %v790_v38, %v1629_v37  ;;  %v793_v40 = vsub.f32 %v1629_v37, %v790_v38 }
0x12a8   :  { %796 = vrot.lane.b32.xlu1 %v792_v39, %s1352_s16  ;;  %v794_v41 = vand.u32 2147483647, %v793_v40 }
0x12aa   :  { %800 = vrot.lane.b32.xlu0 %v794_v41, %s1353_s2 }
0x131a   :  { %v797_v42 = vpop.permute.xlu1 %796 }
0x131c   :  { %v801_v13 = vpop.permute.xlu0 %800 }
0x131d   :  { %v803_v43 = vsel %vm91_vm0, %v797_v42, %v801_v13 }
0x131e   :  { %1215 = vmatmul.mubr.msk.f32.vlgmr.msra.gmra.mrb[16].mxu1 %vm788_vm3, %v803_v43 }
0x13f1   :  { %v888_v51 = vpop.f32.mrb[16].mxu1 }
0x13f2   :  { %v889_v52 = vadd.f32 %v1083_v50, %v888_v51  ;;  %v1216_v53 = vpop.f32.mrb[17].mxu1 }
0x13f4   :  { %v1085_v54 = vmul.f32 -1.442695, %v889_v52 }
0x13f6   :  { %1312 = vpow2.f32 %v1085_v54 }
0x1400   :  { %v1313_v55 = vpop.eup %1312 }
0x1401   :  { %v895_v22 = vadd.f32 1.0, %v1313_v55 }
0x1403   :  { %1314 = vrcp.f32 %v895_v22 }
0x140d   :  { %v1315_v56 = vpop.eup %1314 }
0x140e   :  { %1226 = vmatmul.mubr.msk.f32.vlgmr.msra.gmra.mrb[20].mxu0 %vm91_vm0, %v1315_v56 }
0x14e1   :  { %v978_v58 = vpop.f32.mrb[20].mxu0 }
0x14e2   :  { %v979_v59 = vadd.f32 %v1086_v57, %v978_v58  ;;  %v1227_v60 = vpop.f32.mrb[21].mxu0 }
0x14e4   :  { %v983_v61 = vsel %vm982_vm4, %v979_v59, -inf }
0x14e5   :  { %984 = vmax.xlane.f32.xlu1 %v983_v61 }
0x1572   :  { %v985_v62 = vpop.xlane.xlu1 %984 }
0x1573   :  { %v986_v63 = vsub.f32 %v979_v59, %v985_v62 }
0x1575   :  { %v987_v0 = vmul.f32 1.442695, %v986_v63 }
0x1577   :  { %1316 = vpow2.f32 %v987_v0 }
0x1578   :  { %1318 = vlog2.f32 %v999_v5 }
0x1581   :  { %v1317_v1 = vpop.eup %1316 }
0x1582   :  { %v989_v2 = vsel %vm982_vm4, %v1317_v1, 0.0  ;;  %v1319_v8 = vpop.eup %1318 }
0x1583   :  { %990 = vadd.xlane.f32.xlu0 %v989_v2  ;;  %v1001_v16 = vmul.f32 0.6931472, %v1319_v8 }
0x1610   :  { %v991_v6 = vpop.xlane.xlu0 %990 }
0x1611   :  { %1320 = vrcp.f32 %v991_v6 }
0x1612   :  { %1322 = vlog2.f32 %v991_v6 }
0x161b   :  { %v1321_v9 = vpop.eup %1320 }
0x161c   :  { %v1323_v12 = vpop.eup %1322  ;;  %v993_v14 = vmul.f32 %v1321_v9, %v1317_v1 }
0x161d   :  { %v995_v15 = vmul.f32 0.6931472, %v1323_v12 }
0x161e   :  { %v1027_v4 = vmul.f32 %v1088_v10, %v993_v14 }
0x161f   :  { %v996_v17 = vsub.f32 %v986_v63, %v995_v15 }
0x1620   :  { %v1028_v7 = vsel %vm982_vm4, %v1027_v4, 0.0 }
0x1621   :  { %1029 = vadd.xlane.f32.xlu1 %v1028_v7  ;;  %v1002_v24 = vsub.f32 %v1001_v16, %v996_v17 }
0x1623   :  { %v1003_v18 = vmul.f32 %v1002_v24, %v997_v3 }
0x1625   :  { %v1004_v19 = vsel %vm998_vm5, %v1003_v18, 0.0 }
0x1626   :  { %v1005_v23 = vsel %vm982_vm4, %v1004_v19, 0.0 }
0x1627   :  { %1006 = vadd.xlane.f32.xlu0 %v1005_v23 }
0x1632   :  { %784 = vrot.lane.b32.xlu1 %v1601_v21, %s1350_s3 }
0x163d   :  { %780 = vrot.lane.b32.xlu0 %v1629_v37, %s1352_s16  ;;  %s1355_s16 = smov [#allocation3]  }
0x163e   :  { %s1041_s1 = sshll.u32 %s1355_s16, 4  ;;  %s1042_s1 = int_to_ptr.vmem [resolvable:$true] %s1041_s1 }
0x163f   :  { %s1324_s29 = scalar_lea.vmem %s1042_s1, 16  ;;  %s1328_s30 = scalar_lea.vmem %s1042_s1, 32 }
0x1640   :  { %p1325_p0 = scmp.ne.s32.totalorder %s1042_s1, %s1324_s29  ;;  %p1329_p1 = scmp.lt.s32.totalorder %s1042_s1, %s1042_s1 }
0x1641   :  { %p1330_p2 = scmp.lt.s32.totalorder %s1328_s30, %s1324_s29 }
0x1643   :  { %p1331_p3 = por %p1330_p2, %p1329_p1 }
0x1645   :  { %p1332_p4 = pnand %p1331_p3, %p1325_p0 }
0x16ae   :  { %v1030_v11 = vpop.xlane.xlu1 %1029 }
0x16af   :  { %1032 = vst.msk [vmem:[%s1705_s12] sm:$0x3] %vm1031_vm6, %v1030_v11 }
0x16b2   :  { %v785_v25 = vpop.permute.xlu1 %784 }
0x16b4   :  { %v1007_v20 = vpop.xlane.xlu0 %1006 }
0x16b5   :  { %v1008_v28 = vrot.slane %v1007_v20, 4 }
0x16b7   :  { %v1009_v29 = vadd.f32 %v1008_v28, %v1007_v20 }
0x16b8   :  { %v781_v30 = vpop.permute.xlu0 %780 }
0x16b9   :  { %v1010_v31 = vrot.slane %v1009_v29, 2  ;;  %v787_v32 = vsel %vm91_vm0, %v781_v30, %v785_v25 }
0x16ba   :  { %789 = vst.msk [vmem:[%s1703_s10] sm:$0xff] %vm788_vm3, %v787_v32 }
0x16bb   :  { %v1011_v21 = vadd.f32 %v1010_v31, %v1009_v29 }
0x16bd   :  { %v1012_v26 = vrot.slane %v1011_v21, 1 }
0x16bf   :  { %v1013_v33 = vadd.f32 %v1012_v26, %v1011_v21 }
0x16c1   :  { %1246 = vpush %v1013_v33 }
0x16f2   :  { %s1247_s12 = spop %1246 }
0x16f3   :  { %v1015_v27 = vstv %s1247_s12 }
0x16f4   :  { %v1017_v34 = vmul.f32 0.5, %v1015_v27 }
0x16f6   :  { %1019 = vst.msk [vmem:[#allocation3] sm:$0x1] %vm1018_vm7, %v1017_v34 }
0x16f7   :  { %1335 = shalt.err (!%p1332_p4)
}
0x16f8   :  { %s1336_s14 = scalar_lea.hbm %s1704_s11, 16 }
0x16f9   :  { %p1337_p5 = scmp.ne.s32.totalorder %s1704_s11, %s1336_s14  ;;  %p1340_p6 = scmp.lt.u32.totalorder %s1336_s14, %s1704_s11 }
0x16fb   :  { %p1342_p7 = pnand %p1340_p6, %p1337_p5 }
0x16fd   :  { %1345 = shalt.err (!%p1342_p7)
}
0x16fe   :  { %1044 = dma.vmem_to_hbm [thread:$0]  %s1042_s1, 16, %s1704_s11, [#allocation4]  }
0x16ff   :  { %1346 = dma.done.wait [#allocation4], 16  }
0x1700   :  { %1347 = vsyncadd [#allocation4], 4294967280 }
0x1701   :  { %1054 = vsyncpa [#allocation4], 1 }

</bundles_post_ra>
